<compile_context>
chip_gen: v7x
topology: tpu7x:2x2x1
jax: 0.10.0
libtpu: 0.0.40
codegen_flags: <defaults>
</compile_context>

<pallas_src>
import jax
import jax.numpy as jnp
from jax.experimental import pallas as pl
from jax.experimental.pallas import tpu as pltpu


def _round_up(n, m):
    return ((n + m - 1) // m) * m


def autoencoder_kernel(x_ref, we_ref, be_ref, wd_ref, bd_ref, o_ref):
    """One batch tile of  y = relu(x @ We^T + be) @ Wd^T + bd.

    x_ref:  (TB, D)  float32  (streamed; cast to bf16 in-kernel)
    we_ref: (D, Hp)  bf16     (resident: constant index_map)
    be_ref: (1, Hp)  float32
    wd_ref: (Hp, D)  bf16     (resident)
    bd_ref: (1, D)   float32
    o_ref:  (TB, D)  float32
    """
    # In-kernel f32 -> bf16 cast of the streamed input (no extra XLA pass).
    x = x_ref[...].astype(we_ref.dtype)

    # Encoder: bf16 x bf16 MXU matmul, f32 accumulation; bias + ReLU in f32 (VPU).
    h = jnp.dot(x, we_ref[...], preferred_element_type=jnp.float32)
    h = jnp.maximum(h + be_ref[...], 0.0)

    # Decoder: cast activations back to bf16 for the MXU, accumulate in f32.
    y = jnp.dot(h.astype(wd_ref.dtype), wd_ref[...],
                preferred_element_type=jnp.float32)
    o_ref[...] = (y + bd_ref[...]).astype(o_ref.dtype)


def prepare_params(w_enc, b_enc, w_dec, b_dec, *, compute_dtype=jnp.bfloat16):
    """One-time parameter prep (hoisted out of the per-call forward path).

    w_enc: (H, D_in), b_enc: (H,)   -- PyTorch nn.Linear layout (out, in)
    w_dec: (D_in, H), b_dec: (D_in,)
    Only the hidden dim is zero-padded (to a multiple of 128): it is internal
    to the kernel, so padding it is free and keeps the intermediate lane-dense.
    """
    H, D_in = w_enc.shape
    Hp = _round_up(H, 128)

    we_t = jnp.zeros((D_in, Hp), compute_dtype).at[:, :H].set(
        jnp.transpose(w_enc).astype(compute_dtype))
    wd_t = jnp.zeros((Hp, D_in), compute_dtype).at[:H, :].set(
        jnp.transpose(w_dec).astype(compute_dtype))
    be = jnp.zeros((1, Hp), jnp.float32).at[:, :H].set(
        b_enc.astype(jnp.float32).reshape(1, H))
    bd = b_dec.astype(jnp.float32).reshape(1, D_in)

    return {
        "we_t": we_t, "be": be, "wd_t": wd_t, "bd": bd,
        "d_in": D_in, "h": H, "h_pad": Hp, "compute_dtype": compute_dtype,
    }


def _default_tile_b(B, max_tile_b=512):
    # Aim for >= 2 grid programs (so dimension_semantics=("parallel",) can
    # shard across v7x's two TensorCores) while keeping tiles large enough to
    # amortize the ~0.35 us/step pipeline overhead.  On v5e/v6e, max_tile_b
    # can be raised to 1024 for very large B.
    if B <= 8:
        return _round_up(max(B, 1), 8)
    half = _round_up(-(-B // 2), 8)          # ceil(B/2), rounded to sublanes
    return max(8, min(max_tile_b, half))


def _default_vmem_limit(D_in, Hp, tile_b):
    # Conservative footprint: both weights (assume 2x buffering worst case,
    # bf16), sublane-padded biases, double-buffered f32 x/out tiles, + margin.
    Dp = _round_up(D_in, 128)
    weight_bytes = 2 * 2 * (Dp * Hp + Hp * Dp) * 2
    bias_bytes = 2 * 8 * (Hp + Dp) * 4
    tile_bytes = 2 * tile_b * Dp * (4 + 4)
    need = weight_bytes + bias_bytes + tile_bytes + (2 << 20)
    # Clamp to 64 MiB so the default is safe on v7x (64 MiB VMEM per TC) as
    # well as v5e/v6e (128 MiB).  Beyond this, a K/N-tiled accumulator variant
    # (reduction grid axis + pl.when init/finalize) would be required.
    return int(min(max(need, 8 << 20), 64 << 20))


def autoencoder_forward(x, params, *, tile_b=None, vmem_limit_bytes=None):
    """x: (B, D_in) float32 -> (B, D_in) float32.  No per-call padding/casting."""
    B, D_in = x.shape
    assert D_in == params["d_in"], "feature dim mismatch with prepared params"
    Hp = params["h_pad"]

    x = x.astype(jnp.float32)

    if tile_b is None:
        tile_b = _default_tile_b(B)
    tile_b = max(8, _round_up(tile_b, 8))

    if vmem_limit_bytes is None:
        vmem_limit_bytes = _default_vmem_limit(D_in, Hp, tile_b)

    grid = (pl.cdiv(B, tile_b),)

    out = pl.pallas_call(
        autoencoder_kernel,
        out_shape=jax.ShapeDtypeStruct((B, D_in), jnp.float32),
        grid_spec=pltpu.PrefetchScalarGridSpec(
            num_scalar_prefetch=0,
            grid=grid,
            in_specs=[
                pl.BlockSpec((tile_b, D_in), lambda i: (i, 0)),  # x tile (streamed)
                pl.BlockSpec((D_in, Hp), lambda i: (0, 0)),      # encoder W^T (resident)
                pl.BlockSpec((1, Hp), lambda i: (0, 0)),         # encoder bias
                pl.BlockSpec((Hp, D_in), lambda i: (0, 0)),      # decoder W^T (resident)
                pl.BlockSpec((1, D_in), lambda i: (0, 0)),       # decoder bias
            ],
            out_specs=pl.BlockSpec((tile_b, D_in), lambda i: (i, 0)),
        ),
        compiler_params=pltpu.CompilerParams(
            dimension_semantics=("parallel",),
            vmem_limit_bytes=vmem_limit_bytes),
    )(x, params["we_t"], params["be"], params["wd_t"], params["bd"])

    return out


def reference_forward_f32(x, w_enc, b_enc, w_dec, b_dec):
    h = jnp.maximum(x @ w_enc.T + b_enc, 0.0)
    return h @ w_dec.T + b_dec


def reference_forward_bf16(x, w_enc, b_enc, w_dec, b_dec):
    # Emulates the kernel's numerics: bf16 matmul operands, f32 accumulation,
    # f32 bias / ReLU epilogues.
    f32, bf16 = jnp.float32, jnp.bfloat16
    xe = x.astype(bf16).astype(f32)
    we = w_enc.astype(bf16).astype(f32)
    h = jnp.maximum(xe @ we.T + b_enc.astype(f32), 0.0)
    hd = h.astype(bf16).astype(f32)
    wd = w_dec.astype(bf16).astype(f32)
    return hd @ wd.T + b_dec.astype(f32)


if __name__ == "__main__":
    # Small shapes consistent with the module: Linear acts on (batch, input_size).
    batch, input_size, hidden_size = 8, 64, 32

    key = jax.random.PRNGKey(0)
    kx, k1, k2, k3, k4 = jax.random.split(key, 5)

    x = jax.random.normal(kx, (batch, input_size), dtype=jnp.float32)

    # Deterministic parameter init (uniform, PyTorch-like scale).
    bound_e = 1.0 / (input_size ** 0.5)
    bound_d = 1.0 / (hidden_size ** 0.5)
    w_enc = jax.random.uniform(k1, (hidden_size, input_size), jnp.float32,
                               -bound_e, bound_e)
    b_enc = jax.random.uniform(k2, (hidden_size,), jnp.float32,
                               -bound_e, bound_e)
    w_dec = jax.random.uniform(k3, (input_size, hidden_size), jnp.float32,
                               -bound_d, bound_d)
    b_dec = jax.random.uniform(k4, (input_size,), jnp.float32,
                               -bound_d, bound_d)

    # One-time parameter prep (transpose / hidden-pad / bf16 cast hoisted out).
    params = prepare_params(w_enc, b_enc, w_dec, b_dec)

    out = autoencoder_forward(x, params)
    out = jax.block_until_ready(out)
    assert out.shape == (batch, input_size)
    assert out.dtype == jnp.float32

    # Tight check against a reference that matches the kernel's bf16 numerics.
    ref_bf16 = reference_forward_bf16(x, w_enc, b_enc, w_dec, b_dec)
    assert jnp.allclose(out, ref_bf16, atol=5e-3, rtol=5e-3), \
        "mismatch vs bf16-emulated reference"

    # Loose sanity check against the full-f32 PyTorch-equivalent forward.
    ref_f32 = reference_forward_f32(x, w_enc, b_enc, w_dec, b_dec)
    assert jnp.allclose(out, ref_f32, atol=5e-2, rtol=5e-2), \
        "mismatch vs f32 reference"

    print("KERNEL_OK")
</pallas_src>

<mosaic_0001>
module attributes {stable_mosaic.version = 11 : i64} {
  func.func @autoencoder_kernel(%arg0: i32, %arg1: memref<8x64xf32, #tpu.memory_space<vmem>>, %arg2: memref<64x128xbf16, #tpu.memory_space<vmem>>, %arg3: memref<1x128xf32, #tpu.memory_space<vmem>>, %arg4: memref<128x64xbf16, #tpu.memory_space<vmem>>, %arg5: memref<1x64xf32, #tpu.memory_space<vmem>>, %arg6: memref<8x64xf32, #tpu.memory_space<vmem>>) attributes {dimension_semantics = [#tpu.dimension_semantics<parallel>], iteration_bounds = array<i64: 1>, scalar_prefetch = 0 : i64, scratch_operands = 0 : i64, tpu.core_type = #tpu.core_type<tc>, window_params = [{transform_indices = @transform_0, window_bounds = array<i64: 8, 64>}, {pipeline_mode = #tpu.pipeline_mode<synchronous>, transform_indices = @transform_1, window_bounds = array<i64: 64, 128>}, {pipeline_mode = #tpu.pipeline_mode<synchronous>, transform_indices = @transform_2, window_bounds = array<i64: 1, 128>}, {pipeline_mode = #tpu.pipeline_mode<synchronous>, transform_indices = @transform_3, window_bounds = array<i64: 128, 64>}, {pipeline_mode = #tpu.pipeline_mode<synchronous>, transform_indices = @transform_4, window_bounds = array<i64: 1, 64>}, {transform_indices = @transform_5, window_bounds = array<i64: 8, 64>}]} {
    %c0 = arith.constant 0 : index
    %c0_0 = arith.constant 0 : index
    %0 = vector.load %arg1[%c0, %c0_0] : memref<8x64xf32, #tpu.memory_space<vmem>>, vector<8x64xf32>
    %1 = arith.truncf %0 : vector<8x64xf32> to vector<8x64xbf16>
    %c0_1 = arith.constant 0 : index
    %c0_2 = arith.constant 0 : index
    %2 = vector.load %arg2[%c0_1, %c0_2] : memref<64x128xbf16, #tpu.memory_space<vmem>>, vector<64x128xbf16>
    %cst = arith.constant dense<0.000000e+00> : vector<8x128xf32>
    %3 = tpu.matmul %1, %2, %cst {dimension_numbers = #tpu.dot_dimension_numbers<[1], [0], [0], [1], [0, 0, 1, 1], [], []>} : vector<8x64xbf16>, vector<64x128xbf16>, vector<8x128xf32> -> vector<8x128xf32>
    %c0_3 = arith.constant 0 : index
    %c0_4 = arith.constant 0 : index
    %4 = vector.load %arg3[%c0_3, %c0_4] : memref<1x128xf32, #tpu.memory_space<vmem>>, vector<1x128xf32>
    %5 = vector.broadcast %4 : vector<1x128xf32> to vector<8x128xf32>
    %6 = arith.addf %3, %5 : vector<8x128xf32>
    %cst_5 = arith.constant 0.000000e+00 : f32
    %7 = vector.broadcast %cst_5 : f32 to vector<8x128xf32>
    %8 = arith.maximumf %6, %7 : vector<8x128xf32>
    %9 = arith.truncf %8 : vector<8x128xf32> to vector<8x128xbf16>
    %c0_6 = arith.constant 0 : index
    %c0_7 = arith.constant 0 : index
    %10 = vector.load %arg4[%c0_6, %c0_7] : memref<128x64xbf16, #tpu.memory_space<vmem>>, vector<128x64xbf16>
    %cst_8 = arith.constant dense<0.000000e+00> : vector<8x64xf32>
    %11 = tpu.matmul %9, %10, %cst_8 {dimension_numbers = #tpu.dot_dimension_numbers<[1], [0], [0], [1], [0, 0, 1, 1], [], []>} : vector<8x128xbf16>, vector<128x64xbf16>, vector<8x64xf32> -> vector<8x64xf32>
    %c0_9 = arith.constant 0 : index
    %c0_10 = arith.constant 0 : index
    %12 = vector.load %arg5[%c0_9, %c0_10] : memref<1x64xf32, #tpu.memory_space<vmem>>, vector<1x64xf32>
    %13 = vector.broadcast %12 : vector<1x64xf32> to vector<8x64xf32>
    %14 = arith.addf %11, %13 : vector<8x64xf32>
    %c0_11 = arith.constant 0 : index
    %c0_12 = arith.constant 0 : index
    %15 = vector.load %arg6[%c0_11, %c0_12] : memref<8x64xf32, #tpu.memory_space<vmem>>, vector<8x64xf32>
    tpu.vector_store %arg6[%c0_11, %c0_12], %14 {strides = array<i32>} : memref<8x64xf32, #tpu.memory_space<vmem>>, vector<8x64xf32>,
    return
  }
  func.func @transform_0(%arg0: i32) -> (i32, i32) {
    %c0_i32 = arith.constant 0 : i32
    %c0_i32_0 = arith.constant 0 : i32
    return %arg0, %c0_i32 : i32, i32
  }
  func.func @transform_1(%arg0: i32) -> (i32, i32) {
    %c0_i32 = arith.constant 0 : i32
    %c0_i32_0 = arith.constant 0 : i32
    %c0_i32_1 = arith.constant 0 : i32
    return %c0_i32, %c0_i32_0 : i32, i32
  }
  func.func @transform_2(%arg0: i32) -> (i32, i32) {
    %c0_i32 = arith.constant 0 : i32
    %c0_i32_0 = arith.constant 0 : i32
    %c0_i32_1 = arith.constant 0 : i32
    return %c0_i32, %c0_i32_0 : i32, i32
  }
  func.func @transform_3(%arg0: i32) -> (i32, i32) {
    %c0_i32 = arith.constant 0 : i32
    %c0_i32_0 = arith.constant 0 : i32
    %c0_i32_1 = arith.constant 0 : i32
    return %c0_i32, %c0_i32_0 : i32, i32
  }
  func.func @transform_4(%arg0: i32) -> (i32, i32) {
    %c0_i32 = arith.constant 0 : i32
    %c0_i32_0 = arith.constant 0 : i32
    %c0_i32_1 = arith.constant 0 : i32
    return %c0_i32, %c0_i32_0 : i32, i32
  }
  func.func @transform_5(%arg0: i32) -> (i32, i32) {
    %c0_i32 = arith.constant 0 : i32
    %c0_i32_0 = arith.constant 0 : i32
    return %arg0, %c0_i32 : i32, i32
  }
}

</mosaic_0001>

<bundles_post_ra>
// kernel: tpu_custom_call.1
= control target key start
LH: loop header
LB: loop body
LE: loop exit
PB: predicated region body
PF: predicated region fallthrough
CT: control target
= control target key end

     0   :  { %v335_v1 = vmov 0.0   ;;  %vm336_vm0 = vmmov 0   ;;  %s427_s0 = inlined_call_operand.vmem [shape: f32[8,64], index: 0, kind: input, shape index: {}]   ;;  %s428_s1 = inlined_call_operand.vmem [shape: bf16[64,128], index: 1, kind: input, shape index: {}]   ;;  %s429_s2 = inlined_call_operand.vmem [shape: f32[1,128], index: 2, kind: input, shape index: {}]   ;;  %s430_s3 = inlined_call_operand.vmem [shape: bf16[128,64], index: 3, kind: input, shape index: {}]   ;;  %s431_s4 = inlined_call_operand.vmem [shape: f32[1,64], index: 4, kind: input, shape index: {}]   ;;  %s432_s5 = inlined_call_operand.hbm [shape: f32[8,64], index: 5, kind: output, shape index: {}]  }
   0x1   :  { %v299_v0 = vld [vmem:[%s428_s1] sm:$0xff]   ;;  %264 = vmatprep.subr.bf16.mxu0 %v335_v1  ;;  %276 = vmatprep.subr.bf16.mxu1 %v335_v1  ;;  %v300_v2 = vld [vmem:[%s428_s1 + $0x8] sm:$0xff]   ;;  %v301_v4 = vld [vmem:[%s428_s1 + $0x10] sm:$0xff]  }
   0x2   :  { %265 = vmatpush3.bf16.msra.mxu0 %v299_v0  ;;  %272 = vmatprep.mubr.msk.bf16.mxu0 %vm336_vm0, %v335_v1  ;;  %v303_v3 = vld [vmem:[%s430_s3] sm:$0xff]   ;;  %v304_v5 = vld [vmem:[%s430_s3 + $0x8] sm:$0xff]   ;;  %v302_v6 = vld [vmem:[%s428_s1 + $0x18] sm:$0xff]  }
   0x3   :  { %266 = vmatprep.subr.bf16.mxu0 %v335_v1  ;;  %292 = vmatprep.mubr.msk.bf16.mxu1 %vm336_vm0, %v335_v1  ;;  %v22_v7 = vld [vmem:[%s427_s0] sm:$0xff]  ;;  %v305_v8 = vld [vmem:[%s430_s3 + $0x10] sm:$0xff]  }
   0x4   :  { %277 = vmatpush3.bf16.msra.mxu1 %v303_v3 }
   0x5   :  { %278 = vmatprep.subr.bf16.mxu1 %v335_v1 }
   0x6   :  { %267 = vmatpush3.bf16.msra.mxu0 %v300_v2 }
   0x7   :  { %268 = vmatprep.subr.bf16.mxu0 %v335_v1 }
   0x8   :  { %279 = vmatpush3.bf16.msra.mxu1 %v304_v5 }
   0x9   :  { %280 = vmatprep.subr.bf16.mxu1 %v335_v1 }
   0xa   :  { %269 = vmatpush3.bf16.msra.mxu0 %v301_v4 }
   0xb   :  { %270 = vmatprep.subr.bf16.mxu0 %v335_v1 }
   0xc   :  { %10 = vsyncpa [#allocation3], 0  ;;  %v23_v9 = vpack.c.bf16 %v22_v7, %v22_v7  ;;  %vm63_vm1 = vcmask 523264   ;;  %281 = vmatpush3.bf16.msra.mxu1 %v305_v8  ;;  %v306_v10 = vld [vmem:[%s430_s3 + $0x18] sm:$0xff]   ;;  %v307_v11 = vld [vmem:[%s430_s3 + $0x20] sm:$0xff]   ;;  %s337_s21 = smov [#allocation2]  }
   0xd   :  { %282 = vmatprep.subr.bf16.mxu1 %v335_v1  ;;  %v308_v12 = vld [vmem:[%s430_s3 + $0x28] sm:$0xff]   ;;  %v309_v13 = vld [vmem:[%s430_s3 + $0x30] sm:$0xff]   ;;  %v310_v14 = vld [vmem:[%s430_s3 + $0x38] sm:$0xff]   ;;  %s227_s22 = sshll.u32 %s337_s21, 4  ;;  %s228_s22 = int_to_ptr.vmem [resolvable:$true] %s227_s22 }
   0xe   :  { %271 = vmatpush3.bf16.msra.mxu0 %v302_v6  ;;  %v235_v15 = vld [vmem:[%s429_s2] ss:$0 sm:$0xff]  ;;  %s311_s2 = scalar_lea.vmem %s228_s22, 128  ;;  %p316_p1 = scmp.lt.s32.totalorder %s228_s22, %s228_s22 }
   0xf   :  { %v241_v23 = vld [vmem:[%s431_s4] ss:$0 sm:$0xff]  ;;  %p312_p0 = scmp.ne.s32.totalorder %s228_s22, %s311_s2  ;;  %p317_p2 = scmp.lt.s32.totalorder %s311_s2, %s311_s2 }
  0x10   :  { %283 = vmatpush3.bf16.msra.mxu1 %v306_v10 }
  0x11   :  { %273 = vmatmul.mubr.msk.bf16.vlgmr.msra.gmra.mrb[0].mxu0 %vm63_vm1, %v23_v9  ;;  %284 = vmatprep.subr.bf16.mxu1 %v335_v1  ;;  %p318_p3 = por %p317_p2, %p316_p1 }
  0x13   :  { %p319_p4 = pnand %p318_p3, %p312_p0 }
  0x14   :  { %285 = vmatpush3.bf16.msra.mxu1 %v307_v11 }
  0x15   :  { %286 = vmatprep.subr.bf16.mxu1 %v335_v1 }
  0x18   :  { %287 = vmatpush3.bf16.msra.mxu1 %v308_v12 }
  0x19   :  { %288 = vmatprep.subr.bf16.mxu1 %v335_v1 }
  0x1c   :  { %289 = vmatpush3.bf16.msra.mxu1 %v309_v13 }
  0x1d   :  { %290 = vmatprep.subr.bf16.mxu1 %v335_v1 }
  0x20   :  { %291 = vmatpush3.bf16.msra.mxu1 %v310_v14 }
  0xe4   :  { %v101_v16 = vpop.f32.mrb[0].mxu0 }
  0xe5   :  { %v102_v17 = vadd.f32 %v235_v15, %v101_v16  ;;  %v274_v18 = vpop.f32.mrb[1].mxu0 }
  0xe6   :  { %v104_v19 = vpop.f32.mrb[2].mxu0 }
  0xe7   :  { %v107_v20 = vmax.f32 %v102_v17, 0.0  ;;  %v275_v21 = vpop.f32.mrb[3].mxu0 }
  0xe9   :  { %v108_v22 = vpack.c.bf16 %v107_v20, %v107_v20 }
  0xeb   :  { %293 = vmatmul.mubr.bf16.vlgmr.msra.gmra.mrb[0].mxu1 %v108_v22 }
 0x1be   :  { %v214_v24 = vpop.f32.mrb[0].mxu1 }
 0x1bf   :  { %v215_v25 = vadd.f32 %v241_v23, %v214_v24  ;;  %v294_v26 = vpop.f32.mrb[1].mxu1 }
 0x1c0   :  { %v217_v27 = vpop.f32.mrb[2].mxu1 }
 0x1c1   :  { %220 = vst.msk [vmem:[#allocation2] sm:$0xff] %vm63_vm1, %v215_v25  ;;  %v295_v28 = vpop.f32.mrb[3].mxu1 }
 0x1c2   :  { %322 = shalt.err (!%p319_p4)
}
 0x1c3   :  { %s323_s4 = scalar_lea.hbm %s432_s5, 128 }
 0x1c4   :  { %p324_p5 = scmp.ne.s32.totalorder %s432_s5, %s323_s4  ;;  %p327_p6 = scmp.lt.u32.totalorder %s323_s4, %s432_s5 }
 0x1c6   :  { %p329_p7 = pnand %p327_p6, %p324_p5 }
 0x1c8   :  { %332 = shalt.err (!%p329_p7)
}
 0x1c9   :  { %230 = dma.vmem_to_hbm [thread:$0]  %s228_s22, 128, %s432_s5, [#allocation3]  }
 0x1ca   :  { %333 = dma.done.wait [#allocation3], 128  }
 0x1cb   :  { %334 = vsyncadd [#allocation3], 4294967168 }
 0x1cc   :  { %234 = vsyncpa [#allocation3], 1 }

</bundles_post_ra>
